<compile_context>
chip_gen: v7x
topology: tpu7x:2x2x1
jax: 0.10.0
libtpu: 0.0.40
codegen_flags: <defaults>
</compile_context>

<pallas_src>
import functools
import math

import jax
import jax.numpy as jnp
from jax.experimental import pallas as pl
from jax.experimental.pallas import tpu as pltpu

_SQRT_2_OVER_PI = math.sqrt(2.0 / math.pi)
_MIB = 1024 * 1024


def _gelu_tanh(x):
    # GPT-2 tanh-approximate GELU (matches the PyTorch reference `gelu`).
    return 0.5 * x * (1.0 + jnp.tanh(_SQRT_2_OVER_PI * (x + 0.044715 * x * x * x)))


# --------------------------------------------------------------------------- #
# Tile / budget helpers
# --------------------------------------------------------------------------- #
def _vmem_budget_bytes():
    """Per-core VMEM minus headroom for Mosaic scratch/semaphores, clamped."""
    try:
        cap = int(pltpu.get_tpu_info().vmem_capacity_bytes)
    except Exception:
        cap = 64 * _MIB  # conservative (v7x-sized) default
    return int(min(max(cap - 12 * _MIB, 32 * _MIB), 100 * _MIB))


def _pick_contract_tile(dim, cap):
    """Largest multiple of 128 <= cap dividing dim exactly, else the full dim.

    Contraction tiles MUST divide exactly: a partial K block would multiply
    out-of-bounds garbage into valid accumulator rows.
    """
    t = (min(cap, dim) // 128) * 128
    while t >= 128:
        if dim % t == 0:
            return t
        t -= 128
    return dim


def _pick_out_tile(dim, cap):
    """Lane-dense output-column tile; prefer exact divisors (unmasked stores)."""
    t = (min(cap, dim) // 128) * 128
    while t >= 128:
        if dim % t == 0:
            return t
        t -= 128
    if dim <= cap:
        return dim
    return max(128, (cap // 128) * 128)  # partial edge block; stores are masked


def _pick_row_tile(m, cap):
    tm = min(cap, m)
    if tm != m and tm % 8 != 0:
        tm = max(8, (tm // 8) * 8)
    # v7x has 2 TensorCores: keep >= 2 blocks on the parallel row axis.
    if m >= 16 and -(-m // tm) < 2:
        tm = min(tm, ((-(-m // 2) + 7) // 8) * 8)
    return tm


# --------------------------------------------------------------------------- #
# Fused MLP kernel (default path)
# --------------------------------------------------------------------------- #
def _fused_mlp_kernel(x_ref, wfc_ref, bfc_ref, wproj_ref, bproj_ref, o_ref, acc_ref):
    # Grid: (M/tm, n_state/ts); s is the inner ("arbitrary") accumulation axis.
    s = pl.program_id(1)

    @pl.when(s == 0)
    def _():
        acc_ref[...] = jnp.zeros_like(acc_ref)

    # First Conv1D tile on the MXU: (tm, nx) @ (nx, ts), bias + GELU in f32.
    h = jnp.dot(x_ref[...], wfc_ref[...], preferred_element_type=jnp.float32)
    h = _gelu_tanh(h + bfc_ref[...])
    # Second Conv1D: contract this ts-slice of n_state straight into the f32
    # accumulator; the (tm, n_state) intermediate never touches HBM.
    acc_ref[...] += jnp.dot(
        h.astype(wproj_ref.dtype), wproj_ref[...], preferred_element_type=jnp.float32
    )

    @pl.when(s == pl.num_programs(1) - 1)
    def _():
        o_ref[...] = (acc_ref[...] + bproj_ref[...]).astype(o_ref.dtype)


def _mlp_fused_pallas(x2d, w_fc, b_fc, w_proj, b_proj, *, out_dtype, tm, ts_cap, budget):
    m, nx = x2d.shape
    n_state = w_fc.shape[1]
    nx_out = w_proj.shape[1]

    ts = _pick_contract_tile(n_state, ts_cap)
    out_isz = jnp.dtype(out_dtype).itemsize
    x_isz = x2d.dtype.itemsize
    w_isz = w_fc.dtype.itemsize

    def vmem_est(tm_):
        return (2 * tm_ * nx * x_isz              # x tiles (double-buffered)
                + 2 * nx * ts * w_isz             # W_fc slices
                + 2 * ts * nx_out * w_isz         # W_proj slices
                + 2 * ts * 4 + 2 * nx_out * 4     # biases (f32)
                + 2 * tm_ * nx_out * out_isz      # output tiles
                + tm_ * nx_out * 4                # f32 accumulator
                + tm_ * ts * 6)                   # in-kernel h (f32 + bf16 copy)

    tm_ = _pick_row_tile(m, tm)
    while tm_ > 64 and vmem_est(tm_) > 0.6 * budget:
        tm_ = max(64, ((tm_ // 2) // 8) * 8)
    if vmem_est(tm_) > 0.85 * budget:
        return None  # caller falls back to the two-call streamed-weight path

    n_i = pl.cdiv(m, tm_)
    grid = (n_i, n_state // ts)

    cost = pl.CostEstimate(
        flops=int(2 * m * nx * n_state + 2 * m * n_state * nx_out),
        transcendentals=int(m * n_state),
        bytes_accessed=int(m * nx * x_isz
                           + n_i * nx * n_state * w_isz
                           + n_i * n_state * nx_out * w_isz
                           + n_state * 4 + nx_out * 4
                           + m * nx_out * out_isz),
    )
    vmem_limit = int(min(budget, max(48 * _MIB, int(1.25 * vmem_est(tm_)))))

    # TODO(synk): on v5e, if the weight-slice DMA becomes exposed with bf16,
    # set pipeline_mode=pl.Buffered(3) on the two weight BlockSpecs.
    return pl.pallas_call(
        _fused_mlp_kernel,
        out_shape=jax.ShapeDtypeStruct((m, nx_out), out_dtype),
        grid=grid,
        in_specs=[
            pl.BlockSpec((tm_, nx), lambda i, s: (i, 0)),      # x row tile (fetched once per i)
            pl.BlockSpec((nx, ts), lambda i, s: (0, s)),       # W_fc column slice
            pl.BlockSpec((1, ts), lambda i, s: (0, s)),        # b_fc slice (f32)
            pl.BlockSpec((ts, nx_out), lambda i, s: (s, 0)),   # W_proj row slice
            pl.BlockSpec((1, nx_out), lambda i, s: (0, 0)),    # b_proj (f32)
        ],
        out_specs=pl.BlockSpec((tm_, nx_out), lambda i, s: (i, 0)),
        scratch_shapes=[pltpu.VMEM((tm_, nx_out), jnp.float32)],
        compiler_params=pltpu.CompilerParams(
            dimension_semantics=("parallel", "arbitrary"),
            vmem_limit_bytes=vmem_limit,
        ),
        cost_estimate=cost,
    )(x2d, w_fc, b_fc.reshape(1, n_state), w_proj, b_proj.reshape(1, nx_out))


# --------------------------------------------------------------------------- #
# Two-call fallback: generic tiled matmul + bias (+ fused GELU)
# --------------------------------------------------------------------------- #
def _matmul_bias_kernel(x_ref, w_ref, b_ref, o_ref, acc_ref, *, fuse_gelu):
    k = pl.program_id(2)

    @pl.when(k == 0)
    def _():
        acc_ref[...] = jnp.zeros_like(acc_ref)

    acc_ref[...] += jnp.dot(x_ref[...], w_ref[...], preferred_element_type=jnp.float32)

    @pl.when(k == pl.num_programs(2) - 1)
    def _():
        out = acc_ref[...] + b_ref[...]
        if fuse_gelu:
            out = _gelu_tanh(out)
        o_ref[...] = out.astype(o_ref.dtype)


def _conv1d_pallas(x2d, weight, bias, *, fuse_gelu, out_dtype, tm, tn, tk, budget):
    m, nx = x2d.shape
    nf = weight.shape[1]

    tm_ = _pick_row_tile(m, tm)
    tn_ = _pick_out_tile(nf, tn)
    tk_ = _pick_contract_tile(nx, tk)
    grid = (pl.cdiv(m, tm_), pl.cdiv(nf, tn_), nx // tk_)

    out_isz = jnp.dtype(out_dtype).itemsize
    est = (2 * (tm_ * tk_ * x2d.dtype.itemsize + tk_ * tn_ * weight.dtype.itemsize + tn_ * 4)
           + 2 * tm_ * tn_ * out_isz + tm_ * tn_ * 4)
    vmem_limit = int(min(budget, max(48 * _MIB, int(1.25 * est))))

    cost = pl.CostEstimate(
        flops=int(2 * m * nx * nf),
        transcendentals=int(m * nf if fuse_gelu else 0),
        bytes_accessed=int(grid[1] * m * nx * x2d.dtype.itemsize
                           + grid[0] * nx * nf * weight.dtype.itemsize
                           + grid[0] * nf * 4
                           + m * nf * out_isz),
    )

    kernel = functools.partial(_matmul_bias_kernel, fuse_gelu=fuse_gelu)
    return pl.pallas_call(
        kernel,
        out_shape=jax.ShapeDtypeStruct((m, nf), out_dtype),
        grid=grid,
        in_specs=[
            pl.BlockSpec((tm_, tk_), lambda i, j, k: (i, k)),
            pl.BlockSpec((tk_, tn_), lambda i, j, k: (k, j)),
            pl.BlockSpec((1, tn_), lambda i, j, k: (0, j)),
        ],
        out_specs=pl.BlockSpec((tm_, tn_), lambda i, j, k: (i, j)),
        scratch_shapes=[pltpu.VMEM((tm_, tn_), jnp.float32)],
        compiler_params=pltpu.CompilerParams(
            dimension_semantics=("parallel", "parallel", "arbitrary"),
            vmem_limit_bytes=vmem_limit,
        ),
        cost_estimate=cost,
    )(x2d, weight, bias.reshape(1, nf))


# --------------------------------------------------------------------------- #
# Public wrapper
# --------------------------------------------------------------------------- #
@functools.partial(jax.jit, static_argnames=("tm", "tn", "tk", "mxu_dtype", "fuse"))
def mlp(x, w_fc, b_fc, w_proj, b_proj, *, tm=1024, tn=1024, tk=512,
        mxu_dtype=jnp.bfloat16, fuse=True):
    """GPT-2 MLP forward: gelu(x @ w_fc + b_fc) @ w_proj + b_proj."""
    nx = x.shape[-1]
    n_state = w_fc.shape[1]
    assert w_fc.shape == (nx, n_state), (w_fc.shape, nx)
    assert b_fc.shape == (n_state,), b_fc.shape
    assert w_proj.shape[0] == n_state, (w_proj.shape, n_state)
    nx_out = w_proj.shape[1]
    assert b_proj.shape == (nx_out,), b_proj.shape

    lead = x.shape[:-1]
    m = 1
    for d in lead:
        m *= d
    out_dtype = x.dtype
    x2d = x.reshape(m, nx)

    # Feed the MXU bf16 (f32 accumulation): cast ONCE here so the HBM copies of
    # x and the weights are already narrow -> halves input DMA bytes, no per-step
    # casts inside the kernel.  Biases stay f32 (added pre-downcast).
    if mxu_dtype is not None:
        x2d = x2d.astype(mxu_dtype)
        w_fc_c = w_fc.astype(mxu_dtype)
        w_proj_c = w_proj.astype(mxu_dtype)
    else:
        w_fc_c, w_proj_c = w_fc, w_proj
    b_fc_f32 = b_fc.astype(jnp.float32)
    b_proj_f32 = b_proj.astype(jnp.float32)

    budget = _vmem_budget_bytes()

    out = None
    if fuse:
        out = _mlp_fused_pallas(x2d, w_fc_c, b_fc_f32, w_proj_c, b_proj_f32,
                                out_dtype=out_dtype, tm=tm, ts_cap=tk, budget=budget)
    if out is None:
        # Fallback for shapes whose fused row tile cannot fit VMEM: two calls,
        # intermediate h kept narrow (bf16) so the second matmul streams bf16.
        h_dtype = mxu_dtype if mxu_dtype is not None else out_dtype
        h = _conv1d_pallas(x2d, w_fc_c, b_fc_f32, fuse_gelu=True,
                           out_dtype=h_dtype, tm=tm, tn=tn, tk=tk, budget=budget)
        out = _conv1d_pallas(h, w_proj_c, b_proj_f32, fuse_gelu=False,
                             out_dtype=out_dtype, tm=tm, tn=tn, tk=tk, budget=budget)
    return out.reshape(*lead, nx_out)


# --------------------------------------------------------------------------- #
# Self-test
# --------------------------------------------------------------------------- #
if __name__ == "__main__":
    key = jax.random.PRNGKey(0)
    k_x, k_fc, k_bfc, k_proj, k_bproj = jax.random.split(key, 5)

    # Small shapes consistent with the module: x = (batch, seq, n_embd),
    # n_state = 4 * n_embd (GPT-2 MLP expansion).
    batch, seq, n_embd = 2, 8, 32
    n_state = 4 * n_embd  # 128

    x = jax.random.normal(k_x, (batch, seq, n_embd), dtype=jnp.float32)
    w_fc = 0.02 * jax.random.normal(k_fc, (n_embd, n_state), dtype=jnp.float32)
    b_fc = 0.01 * jax.random.normal(k_bfc, (n_state,), dtype=jnp.float32)
    w_proj = 0.02 * jax.random.normal(k_proj, (n_state, n_embd), dtype=jnp.float32)
    b_proj = 0.01 * jax.random.normal(k_bproj, (n_embd,), dtype=jnp.float32)

    y = jax.block_until_ready(mlp(x, w_fc, b_fc, w_proj, b_proj))

    def gelu_ref(v):
        return 0.5 * v * (1.0 + jnp.tanh(math.sqrt(2.0 / math.pi) * (v + 0.044715 * v ** 3)))

    # Reference matched to the kernel's numerics: bf16-rounded operands, f32 accumulation.
    def rnd(a):
        return a.astype(jnp.bfloat16).astype(jnp.float32)

    xb = rnd(x.reshape(-1, n_embd))
    h_ref = gelu_ref(xb @ rnd(w_fc) + b_fc)
    y_ref = (rnd(h_ref) @ rnd(w_proj) + b_proj).reshape(batch, seq, n_embd)

    assert y.shape == (batch, seq, n_embd) and y.dtype == x.dtype
    max_err = float(jnp.max(jnp.abs(y - y_ref)))
    assert jnp.allclose(y, y_ref, atol=2e-3, rtol=2e-3), max_err

    # Sanity vs pure-f32 math (looser tolerance because of the bf16 MXU feed).
    h32 = gelu_ref(x.reshape(-1, n_embd) @ w_fc + b_fc)
    y32 = (h32 @ w_proj + b_proj).reshape(batch, seq, n_embd)
    assert jnp.allclose(y, y32, atol=5e-2, rtol=5e-2)

    print("KERNEL_OK")
</pallas_src>

<mosaic_0001>
module attributes {stable_mosaic.version = 11 : i64} {
  func.func @_fused_mlp_kernel(%arg0: i32, %arg1: i32, %arg2: memref<8x32xbf16, #tpu.memory_space<vmem>>, %arg3: memref<32x128xbf16, #tpu.memory_space<vmem>>, %arg4: memref<1x128xf32, #tpu.memory_space<vmem>>, %arg5: memref<128x32xbf16, #tpu.memory_space<vmem>>, %arg6: memref<1x32xf32, #tpu.memory_space<vmem>>, %arg7: memref<8x32xf32, #tpu.memory_space<vmem>>, %arg8: memref<8x32xf32, #tpu.memory_space<vmem>>) attributes {dimension_semantics = [#tpu.dimension_semantics<parallel>, #tpu.dimension_semantics<arbitrary>], iteration_bounds = array<i64: 2, 1>, scalar_prefetch = 0 : i64, scratch_operands = 1 : i64, tpu.core_type = #tpu.core_type<tc>, window_params = [{transform_indices = @transform_0, window_bounds = array<i64: 8, 32>}, {transform_indices = @transform_1, window_bounds = array<i64: 32, 128>}, {transform_indices = @transform_2, window_bounds = array<i64: 1, 128>}, {transform_indices = @transform_3, window_bounds = array<i64: 128, 32>}, {pipeline_mode = #tpu.pipeline_mode<synchronous>, transform_indices = @transform_4, window_bounds = array<i64: 1, 32>}, {transform_indices = @transform_5, window_bounds = array<i64: 8, 32>}]} {
    %c0_i32 = arith.constant 0 : i32
    %0 = arith.cmpi eq, %arg1, %c0_i32 : i32
    %1 = arith.extui %0 : i1 to i32
    %c0_i32_0 = arith.constant 0 : i32
    %2 = arith.cmpi ne, %1, %c0_i32_0 : i32
    scf.if %2 {
      %cst_19 = arith.constant 0.000000e+00 : f32
      %31 = vector.broadcast %cst_19 : f32 to vector<8x32xf32>
      %c0_20 = arith.constant 0 : index
      %c0_21 = arith.constant 0 : index
      %32 = vector.load %arg8[%c0_20, %c0_21] : memref<8x32xf32, #tpu.memory_space<vmem>>, vector<8x32xf32>
      tpu.vector_store %arg8[%c0_20, %c0_21], %31 {strides = array<i32>} : memref<8x32xf32, #tpu.memory_space<vmem>>, vector<8x32xf32>,
    } else {
    }
    %c0 = arith.constant 0 : index
    %c0_1 = arith.constant 0 : index
    %3 = vector.load %arg2[%c0, %c0_1] : memref<8x32xbf16, #tpu.memory_space<vmem>>, vector<8x32xbf16>
    %c0_2 = arith.constant 0 : index
    %c0_3 = arith.constant 0 : index
    %4 = vector.load %arg3[%c0_2, %c0_3] : memref<32x128xbf16, #tpu.memory_space<vmem>>, vector<32x128xbf16>
    %cst = arith.constant dense<0.000000e+00> : vector<8x128xf32>
    %5 = tpu.matmul %3, %4, %cst {dimension_numbers = #tpu.dot_dimension_numbers<[1], [0], [0], [1], [0, 0, 1, 1], [], []>} : vector<8x32xbf16>, vector<32x128xbf16>, vector<8x128xf32> -> vector<8x128xf32>
    %c0_4 = arith.constant 0 : index
    %c0_5 = arith.constant 0 : index
    %6 = vector.load %arg4[%c0_4, %c0_5] : memref<1x128xf32, #tpu.memory_space<vmem>>, vector<1x128xf32>
    %7 = vector.broadcast %6 : vector<1x128xf32> to vector<8x128xf32>
    %8 = arith.addf %5, %7 : vector<8x128xf32>
    %cst_6 = arith.constant 5.000000e-01 : f32
    %9 = vector.broadcast %cst_6 : f32 to vector<8x128xf32>
    %10 = arith.mulf %9, %8 : vector<8x128xf32>
    %cst_7 = arith.constant 4.471500e-02 : f32
    %11 = vector.broadcast %cst_7 : f32 to vector<8x128xf32>
    %12 = arith.mulf %11, %8 : vector<8x128xf32>
    %13 = arith.mulf %12, %8 : vector<8x128xf32>
    %14 = arith.mulf %13, %8 : vector<8x128xf32>
    %15 = arith.addf %8, %14 : vector<8x128xf32>
    %cst_8 = arith.constant 0.797884583 : f32
    %16 = vector.broadcast %cst_8 : f32 to vector<8x128xf32>
    %17 = arith.mulf %16, %15 : vector<8x128xf32>
    %18 = math.tanh %17 : vector<8x128xf32>
    %cst_9 = arith.constant 1.000000e+00 : f32
    %19 = vector.broadcast %cst_9 : f32 to vector<8x128xf32>
    %20 = arith.addf %19, %18 : vector<8x128xf32>
    %21 = arith.mulf %10, %20 : vector<8x128xf32>
    %c0_10 = arith.constant 0 : index
    %c0_11 = arith.constant 0 : index
    %22 = vector.load %arg8[%c0_10, %c0_11] : memref<8x32xf32, #tpu.memory_space<vmem>>, vector<8x32xf32>
    %23 = arith.truncf %21 : vector<8x128xf32> to vector<8x128xbf16>
    %c0_12 = arith.constant 0 : index
    %c0_13 = arith.constant 0 : index
    %24 = vector.load %arg5[%c0_12, %c0_13] : memref<128x32xbf16, #tpu.memory_space<vmem>>, vector<128x32xbf16>
    %cst_14 = arith.constant dense<0.000000e+00> : vector<8x32xf32>
    %25 = tpu.matmul %23, %24, %cst_14 {dimension_numbers = #tpu.dot_dimension_numbers<[1], [0], [0], [1], [0, 0, 1, 1], [], []>} : vector<8x128xbf16>, vector<128x32xbf16>, vector<8x32xf32> -> vector<8x32xf32>
    %26 = arith.addf %22, %25 : vector<8x32xf32>
    %c0_15 = arith.constant 0 : index
    %c0_16 = arith.constant 0 : index
    %27 = vector.load %arg8[%c0_15, %c0_16] : memref<8x32xf32, #tpu.memory_space<vmem>>, vector<8x32xf32>
    tpu.vector_store %arg8[%c0_15, %c0_16], %26 {strides = array<i32>} : memref<8x32xf32, #tpu.memory_space<vmem>>, vector<8x32xf32>,
    %c0_i32_17 = arith.constant 0 : i32
    %28 = arith.cmpi eq, %arg1, %c0_i32_17 : i32
    %29 = arith.extui %28 : i1 to i32
    %c0_i32_18 = arith.constant 0 : i32
    %30 = arith.cmpi ne, %29, %c0_i32_18 : i32
    scf.if %30 {
      %c0_19 = arith.constant 0 : index
      %c0_20 = arith.constant 0 : index
      %31 = vector.load %arg8[%c0_19, %c0_20] : memref<8x32xf32, #tpu.memory_space<vmem>>, vector<8x32xf32>
      %c0_21 = arith.constant 0 : index
      %c0_22 = arith.constant 0 : index
      %32 = vector.load %arg6[%c0_21, %c0_22] : memref<1x32xf32, #tpu.memory_space<vmem>>, vector<1x32xf32>
      %33 = vector.broadcast %32 : vector<1x32xf32> to vector<8x32xf32>
      %34 = arith.addf %31, %33 : vector<8x32xf32>
      %c0_23 = arith.constant 0 : index
      %c0_24 = arith.constant 0 : index
      %35 = vector.load %arg7[%c0_23, %c0_24] : memref<8x32xf32, #tpu.memory_space<vmem>>, vector<8x32xf32>
      tpu.vector_store %arg7[%c0_23, %c0_24], %34 {strides = array<i32>} : memref<8x32xf32, #tpu.memory_space<vmem>>, vector<8x32xf32>,
    } else {
    }
    return
  }
  func.func @transform_0(%arg0: i32, %arg1: i32) -> (i32, i32) {
    %c0_i32 = arith.constant 0 : i32
    %c0_i32_0 = arith.constant 0 : i32
    return %arg0, %c0_i32 : i32, i32
  }
  func.func @transform_1(%arg0: i32, %arg1: i32) -> (i32, i32) {
    %c0_i32 = arith.constant 0 : i32
    %c0_i32_0 = arith.constant 0 : i32
    return %c0_i32, %arg1 : i32, i32
  }
  func.func @transform_2(%arg0: i32, %arg1: i32) -> (i32, i32) {
    %c0_i32 = arith.constant 0 : i32
    %c0_i32_0 = arith.constant 0 : i32
    return %c0_i32, %arg1 : i32, i32
  }
  func.func @transform_3(%arg0: i32, %arg1: i32) -> (i32, i32) {
    %c0_i32 = arith.constant 0 : i32
    %c0_i32_0 = arith.constant 0 : i32
    return %arg1, %c0_i32 : i32, i32
  }
  func.func @transform_4(%arg0: i32, %arg1: i32) -> (i32, i32) {
    %c0_i32 = arith.constant 0 : i32
    %c0_i32_0 = arith.constant 0 : i32
    %c0_i32_1 = arith.constant 0 : i32
    return %c0_i32, %c0_i32_0 : i32, i32
  }
  func.func @transform_5(%arg0: i32, %arg1: i32) -> (i32, i32) {
    %c0_i32 = arith.constant 0 : i32
    %c0_i32_0 = arith.constant 0 : i32
    return %arg0, %c0_i32 : i32, i32
  }
}

</mosaic_0001>

<bundles_post_ra>
// kernel: mlp.1
= control target key start
LH: loop header
LB: loop body
LE: loop exit
PB: predicated region body
PF: predicated region fallthrough
CT: control target
= control target key end

     0   :  { %10 = vsyncpa [#allocation4], 0  ;;  %s1014_s0 = inlined_call_operand.vmem [shape: bf16[16,32], index: 0, kind: input, shape index: {}]   ;;  %s1015_s1 = inlined_call_operand.vmem [shape: bf16[32,128], index: 1, kind: input, shape index: {}]   ;;  %s1016_s2 = inlined_call_operand.vmem [shape: f32[1,128], index: 2, kind: input, shape index: {}]   ;;  %s1017_s3 = inlined_call_operand.vmem [shape: bf16[128,32], index: 3, kind: input, shape index: {}]   ;;  %s1018_s4 = inlined_call_operand.vmem [shape: f32[1,32], index: 4, kind: input, shape index: {}]   ;;  %s1019_s5 = inlined_call_operand.hbm [shape: f32[16,32], index: 5, kind: output, shape index: {}]  }
   0x1   :  { %12 = vsyncpa [#allocation4 + $0x1], 0  ;;  %s862_s18 = smov 0   ;;  %s864_s19 = smov 0  }
   0x2   :  { %s866_s20 = smov 0   ;;  %s868_s21 = smov 0  }
   0x3   :  { %s870_s22 = smov 0   ;;  %s872_s23 = smov 0  }
   0x4 LB: > { %s613_s24 = sadd.s32 4294967295, %s827_s23   ;;  %s614_s25 = sadd.s32 4294967294, %s827_s23   ;;  %s827_s23 = sphi %s872_s23, %s18_s23   ;;  %s823_s22 = sphi %s870_s22, %s1026_s22   ;;  %s819_s21 = sphi %s868_s21, %s1025_s21   ;;  %s815_s20 = sphi %s866_s20, %s1024_s20   ;;  %s811_s19 = sphi %s864_s19, %s1023_s19   ;;  %s807_s18 = sphi %s862_s18, %s1022_s18  }
   0x5   : > { %s30_s26 = sadd.s32 1, %s823_s22  ;;  %s162_s27 = sadd.s32 1, %s815_s20 }
   0x6   : > { %p32_p0 = scmp.ge.s32.totalorder %s30_s26, 2  ;;  %p172_p1 = scmp.ne.s32.totalorder %s815_s20, %s811_s19 }
   0x7   : > { %p173_p2 = scmp.eq.s32.totalorder %s613_s24, 1  ;;  %p178_p3 = scmp.ne.s32.totalorder %s811_s19, %s807_s18 }
   0x8   : > { %s1028_s26 = smov (%p32_p0, %s30_s26), 0  ;;  %p179_p5 = scmp.eq.s32.totalorder %s614_s25, 1 }
   0x9   : > { %p902_p4 = por %p173_p2, %p172_p1  ;;  %s159_s29 = ssub.s32 %s823_s22, %s1028_s26 }
   0xa   : > { %p620_p6 = scmp.ge.s32.totalorder %s827_s23, 1  ;;  %p160_p7 = scmp.eq.s32.totalorder %s159_s29, 0 }
   0xb   : > { %p909_p8 = por %p179_p5, %p178_p3  ;;  %p229_p9 = scmp.lt.s32.totalorder %s827_s23, 3 }
   0xc   : > { %s915_s6 = scalar_select %p160_p7, %s815_s20, %s162_s27  }
   0xd   : > { %p230_p10 = pnand %p620_p6, %p229_p9 }
   0xe   : > { %v737_v0 = vld [vmem:[%s1015_s1] sm:$0xff] (!%p230_p10)   ;;  %v829_v1 = vmov (!%p230_p10), 0.0   ;;  %v738_v2 = vld [vmem:[%s1015_s1 + $0x8] sm:$0xff] (!%p230_p10)   ;;  %vm830_vm0 = vmmov (!%p230_p10), 0   ;;  %p268_p11 = scmp.lt.s32.totalorder (!%p230_p10), %s819_s21, 1  ;;  %vm290_vm1 = vcmask (!%p230_p10), 261120  }
   0xf   : > { %233 = sbr.rel (%p230_p10) target bundleno = 506 (0x1fa), region = 40  ;;  %652 = vmatprep.subr.bf16.mxu0 (!%p230_p10), %v829_v1  ;;  %660 = vmatprep.subr.bf16.mxu1 (!%p230_p10), %v829_v1  ;;  %291 = vst.msk [vmem:[#allocation2] sm:$0xff] (!%p230_p10), %vm290_vm1, %v829_v1  ;;  %v739_v3 = vld [vmem:[%s1017_s3] sm:$0xff] (!%p230_p10)   ;;  %v740_v5 = vld [vmem:[%s1017_s3 + $0x8] sm:$0xff] (!%p230_p10)   ;;  %v741_v6 = vld [vmem:[%s1017_s3 + $0x10] sm:$0xff] (!%p230_p10)   ;;  %s265_s25 = sand.u32 (!%p230_p10), 1, %s811_s19  }
  0x10   : > { %653 = vmatpush3.bf16.msra.mxu0 (!%p230_p10), %v737_v0  ;;  %656 = vmatprep.mubr.msk.bf16.mxu0 (!%p230_p10), %vm830_vm0, %v829_v1  ;;  %v742_v7 = vld [vmem:[%s1017_s3 + $0x18] sm:$0xff] (!%p230_p10)   ;;  %v743_v8 = vld [vmem:[%s1017_s3 + $0x20] sm:$0xff] (!%p230_p10)   ;;  %v744_v9 = vld [vmem:[%s1017_s3 + $0x28] sm:$0xff] (!%p230_p10)   ;;  %s621_s27 = sshll.u32 (!%p230_p10), %s265_s25, 3  ;;  %s637_s8 = sshll.u32 (!%p230_p10), %s819_s21, 7 }
  0x11   : > { %654 = vmatprep.subr.bf16.mxu0 (!%p230_p10), %v829_v1  ;;  %676 = vmatprep.mubr.msk.bf16.mxu1 (!%p230_p10), %vm830_vm0, %v829_v1  ;;  %v745_v10 = vld [vmem:[%s1017_s3 + $0x30] sm:$0xff] (!%p230_p10)   ;;  %v746_v11 = vld [vmem:[%s1017_s3 + $0x38] sm:$0xff] (!%p230_p10)   ;;  %v623_v12 = vld [vmem:[%s1016_s2] ss:$0 sm:$0xff] (!%p230_p10)  ;;  %s267_s9 = scalar_lea.vmem (!%p230_p10), [#allocation3], %s621_s27 }
  0x12   : > { %661 = vmatpush3.bf16.msra.mxu1 (!%p230_p10), %v739_v3  ;;  %v635_v34 = vld [vmem:[%s1018_s4] ss:$0 sm:$0xff] (!%p230_p10)  ;;  %s504_s10 = sshll.u32 (!%p230_p10), %s267_s9, 4  ;;  %s968_s10 = int_to_ptr.vmem [resolvable:$true] %s504_s10 }
  0x13   : > { %662 = vmatprep.subr.bf16.mxu1 (!%p230_p10), %v829_v1  ;;  %s749_s15 = scalar_lea.vmem (!%p230_p10), %s968_s10, 128 }
  0x14   : > { %655 = vmatpush3.bf16.msra.mxu0 (!%p230_p10), %v738_v2  ;;  %p750_p12 = scmp.ne.s32.totalorder (!%p230_p10), %s968_s10, %s749_s15 }
  0x16   : > { %s269_s13 = scalar_select %p268_p11, %s819_s21, 1  ;;  %663 = vmatpush3.bf16.msra.mxu1 %v740_v5  ;;  %v369_v28 = vld [vmem:[#allocation2] sm:$0xff] }
  0x17   : > { %664 = vmatprep.subr.bf16.mxu1 %v829_v1  ;;  %p751_p13 = pnand %p750_p12, %p902_p4  ;;  %s831_s21 = smov [#allocation3]  }
  0x18   : > { %s622_s14 = sshll.u32 %s269_s13, 2  ;;  %s966_s13 = scalar_lea.hbm %s1019_s5, %s637_s8 }
  0x19   : > { %s271_s17 = scalar_lea.vmem %s1014_s0, %s622_s14  ;;  %s491_s14 = scalar_lea.sflag [#allocation4], %s265_s25 }
  0x1a   : > { %v292_v4 = vld [vmem:[%s271_s17] sm:$0xf]  ;;  %665 = vmatpush3.bf16.msra.mxu1 %v741_v6  ;;  %p752_p0 = pneg %p751_p13  ;;  %s753_s16 = sshll.u32 %s831_s21, 4  ;;  %s754_s16 = int_to_ptr.vmem [resolvable:$false] %s753_s16 }
  0x1b   : > { %657 = vmatmul.mubr.msk.bf16.vlgmr.msra.gmra.mrb[0].mxu0 %vm290_vm1, %v292_v4  ;;  %666 = vmatprep.subr.bf16.mxu1 %v829_v1  ;;  %s755_s17 = scalar_lea.vmem %s754_s16, 256  ;;  %p756_p1 = scmp.lt.s32.totalorder %s968_s10, %s754_s16 }
  0x1c   : > { %p757_p2 = scmp.lt.s32.totalorder %s755_s17, %s749_s15 }
  0x1e   : > { %667 = vmatpush3.bf16.msra.mxu1 %v742_v7  ;;  %p758_p3 = por %p757_p2, %p756_p1 }
  0x1f   : > { %668 = vmatprep.subr.bf16.mxu1 %v829_v1 }
  0x20   : > { %p759_p5 = pnand %p758_p3, %p752_p0 }
  0x22   : > { %669 = vmatpush3.bf16.msra.mxu1 %v743_v8 }
  0x23   : > { %670 = vmatprep.subr.bf16.mxu1 %v829_v1 }
  0x26   : > { %671 = vmatpush3.bf16.msra.mxu1 %v744_v9 }
  0x27   : > { %672 = vmatprep.subr.bf16.mxu1 %v829_v1 }
  0x2a   : > { %673 = vmatpush3.bf16.msra.mxu1 %v745_v10 }
  0x2b   : > { %674 = vmatprep.subr.bf16.mxu1 %v829_v1 }
  0x2e   : > { %675 = vmatpush3.bf16.msra.mxu1 %v746_v11 }
  0xee   : > { %v354_v13 = vpop.f32.mrb[0].mxu0 }
  0xef   : > { %v355_v14 = vadd.f32 %v623_v12, %v354_v13  ;;  %v658_v15 = vpop.f32.mrb[1].mxu0 }
  0xf0   : > { %v357_v16 = vpop.f32.mrb[2].mxu0 }
  0xf1   : > { %v361_v17 = vmul.f32 0.044715, %v355_v14  ;;  %v659_v18 = vpop.f32.mrb[3].mxu0  ;;  %v360_v24 = vmul.f32 0.5, %v355_v14 }
  0xf3   : > { %v362_v19 = vmul.f32 %v361_v17, %v355_v14 }
  0xf5   : > { %v363_v20 = vmul.f32 %v362_v19, %v355_v14 }
  0xf7   : > { %v364_v21 = vadd.f32 %v363_v20, %v355_v14 }
  0xf9   : > { %v365_v22 = vmul.f32 0.7978846, %v364_v21 }
  0xfb   : > { %747 = vtanh.f32 %v365_v22 }
 0x105   : > { %v748_v23 = vpop.eup %747 }
 0x106   : > { %v367_v25 = vadd.f32 1.0, %v748_v23 }
 0x108   : > { %v368_v26 = vmul.f32 %v367_v25, %v360_v24 }
 0x10a   : > { %v370_v27 = vpack.c.bf16 %v368_v26, %v368_v26 }
 0x10c   : > { %677 = vmatmul.mubr.bf16.vlgmr.msra.gmra.mrb[0].mxu1 %v370_v27 }
 0x1df   : > { %v469_v29 = vpop.f32.mrb[0].mxu1 }
 0x1e0   : > { %v475_v30 = vadd.f32 %v469_v29, %v369_v28  ;;  %v678_v31 = vpop.f32.mrb[1].mxu1 }
 0x1e1   : > { %v472_v32 = vpop.f32.mrb[2].mxu1 }
 0x1e2   : > { %476 = vst.msk [vmem:[#allocation2] sm:$0xff] %vm290_vm1, %v475_v30  ;;  %v679_v33 = vpop.f32.mrb[3].mxu1 }
 0x1e9   : > { %v480_v35 = vld [vmem:[#allocation2] sm:$0xff] }
 0x1ea   : > { %v488_v36 = vadd.f32 %v635_v34, %v480_v35 }
 0x1ec   : > { %489 = vst.msk [vmem:[%s267_s9] sm:$0xff] %vm290_vm1, %v488_v36 }
 0x1ed   : > { %762 = shalt.err (!%p759_p5)
}
 0x1ee   : > { %s763_s24 = scalar_lea.hbm %s966_s13, 128  ;;  %s767_s29 = scalar_lea.hbm %s1019_s5, 256 }
 0x1ef   : > { %p764_p6 = scmp.ne.s32.totalorder %s966_s13, %s763_s24  ;;  %p768_p10 = scmp.lt.u32.totalorder %s966_s13, %s1019_s5 }
 0x1f0   : > { %p769_p11 = scmp.lt.u32.totalorder %s767_s29, %s763_s24  ;;  %p771_p13 = scmp.lt.u32.totalorder %s763_s24, %s966_s13 }
 0x1f1   : > { %p765_p7 = pnand %p764_p6, %p902_p4 }
 0x1f2   : > { %p770_p12 = por %p769_p11, %p768_p10 }
 0x1f3   : > { %p766_p9 = pneg %p765_p7 }
 0x1f4   : > { %p772_p0 = por %p771_p13, %p770_p12 }
 0x1f6   : > { %p773_p1 = pnand %p772_p0, %p766_p9 }
 0x1f8   : > { %776 = shalt.err (!%p773_p1)
}
 0x1f9   : > { %680 = dma.vmem_to_hbm [thread:$0]  (%p902_p4), %s968_s10, 128, %s966_s13, %s491_s14  }
 0x1fa PF: > { %p686_p2 = scmp.ge.s32.totalorder %s827_s23, 2  ;;  %s516_s9 = sand.u32 1, %s807_s18  }
 0x1fb   : > { %s517_s11 = scalar_lea.sflag [#allocation4], %s516_s9 }
 0x1fc   : > { %p683_p3 = pnand %p686_p2, %p909_p8 }
 0x1fe   : > { %802 = dma.done.wait (!%p683_p3), %s517_s11, 128  }
 0x1ff   : > { %804 = vsyncadd (!%p683_p3), %s517_s11, 4294967168  ;;  %s18_s23 = sadd.s32 1, %s827_s23   ;;  %s1022_s18 = smov %s811_s19 }
 0x200   : > { %p15_p5 = scmp.ge.s32.totalorder %s18_s23, 4   ;;  %s1023_s19 = smov %s815_s20 }
 0x201   : > { %s1024_s20 = smov %s915_s6  ;;  %s1025_s21 = smov %s823_s22 }
 0x202   : > { %s1026_s22 = smov %s1028_s26  ;;  %17 = sbr.rel (!%p15_p5) target bundleno = 4 (0x4), region = 92 }
 0x209   :  { %522 = vsyncpa [#allocation4], 1 }
 0x20a   :  { %524 = vsyncpa [#allocation4 + $0x1], 1 }

</bundles_post_ra>
